<compile_context>
chip_gen: v5e
topology: v5e:2x2
jax: 0.10.0
libtpu: 0.0.40
codegen_flags: <defaults>
</compile_context>

<pallas_src>
import functools
import math

import jax
import jax.numpy as jnp
from jax import lax
from jax.experimental import pallas as pl
from jax.experimental.pallas import tpu as pltpu


def _round_up(v, m):
    return ((v + m - 1) // m) * m


def _choose_tile(n, target=512):
    """Node tile size: multiple of 128, <= target, and chosen so the padded
    node dimension yields >= 2 row tiles when possible (keeps both v7x
    TensorCores busy on the 'parallel' grid axis)."""
    n128 = _round_up(n, 128)
    t = min(target, n128)
    if n128 > 128 and n128 // t < 2:
        t = max(128, ((n128 // 2) // 128) * 128)
    return t


# ---------------------------------------------------------------------------
# Kernel 1: feature transform  HW = h @ W   (once per layer).
# ---------------------------------------------------------------------------
def _transform_kernel(h_ref, w_ref, out_ref):
    out_ref[...] = jnp.dot(h_ref[...], w_ref[...],
                           preferred_element_type=jnp.float32
                           ).astype(out_ref.dtype)


def _feature_transform(h_p, w_p, *, tile):
    Np, Fin = h_p.shape
    Fout = w_p.shape[1]
    assert Np % tile == 0
    n_tiles = Np // tile

    vmem_bytes = (2 * (tile * Fin * 2 + Fin * Fout * 2 + tile * Fout * 2)
                  + tile * Fout * 4)
    return pl.pallas_call(
        _transform_kernel,
        out_shape=jax.ShapeDtypeStruct((Np, Fout), jnp.bfloat16),
        grid_spec=pltpu.PrefetchScalarGridSpec(
            num_scalar_prefetch=0,
            grid=(n_tiles,),
            in_specs=[
                pl.BlockSpec((tile, Fin), lambda i: (i, 0)),
                pl.BlockSpec((Fin, Fout), lambda i: (0, 0)),
            ],
            out_specs=pl.BlockSpec((tile, Fout), lambda i: (i, 0)),
        ),
        compiler_params=pltpu.CompilerParams(
            dimension_semantics=("parallel",),
            vmem_limit_bytes=int(2 * vmem_bytes + (4 << 20)),
        ),
        cost_estimate=pl.CostEstimate(
            flops=int(2 * Np * Fin * Fout),
            transcendentals=0,
            bytes_accessed=int(Np * Fin * 2 + Fin * Fout * 2 + Np * Fout * 2),
        ),
    )(h_p, w_p)


# ---------------------------------------------------------------------------
# Kernel 2: aggregation + epilogue  out = post(adj @ HW + b).
# ---------------------------------------------------------------------------
def _agg_kernel(colmap_ref, mask_ref, adj_ref, hw_ref, b_ref, s_ref, t_ref,
                out_ref, acc_ref, *, mode, nclass):
    i = pl.program_id(0)
    k = pl.program_id(1)

    @pl.when(k == 0)
    def _():
        acc_ref[...] = jnp.zeros_like(acc_ref)

    # Skip the MXU work entirely for empty adjacency tiles (their DMA is
    # already elided because the index_map repeats the previous block index).
    @pl.when(mask_ref[i, k] != 0)
    def _():
        acc_ref[...] += jnp.dot(adj_ref[...], hw_ref[...],
                                preferred_element_type=jnp.float32)

    @pl.when(k == pl.num_programs(1) - 1)
    def _():
        z = acc_ref[...] + b_ref[...]                  # bias, finalize only
        if mode == "hidden":
            h = jnp.maximum(z, 0.0)                    # ReLU
            # dropout (eval) = identity; BatchNorm1d (eval) = affine
            h = h * s_ref[...] + t_ref[...]
            out_ref[...] = h.astype(out_ref.dtype)
        else:
            # masked log_softmax over the (padded) class axis
            lane = lax.broadcasted_iota(jnp.int32, z.shape, 1)
            z = jnp.where(lane < nclass, z, -jnp.inf)
            m = jnp.max(z, axis=1, keepdims=True)
            e = jnp.exp(z - m)
            lse = m + jnp.log(jnp.sum(e, axis=1, keepdims=True))
            out_ref[...] = (z - lse).astype(out_ref.dtype)


def _aggregate(adj_p, colmap, mask, hw_p, b_p, s_p, t_p, *, mode, nclass,
               tile, out_dtype):
    Np = adj_p.shape[0]
    Fout = hw_p.shape[1]
    assert Np % tile == 0
    n_tiles = Np // tile

    # index_maps receive the scalar-prefetch refs as trailing positional args.
    def adj_map(i, k, colmap_ref, mask_ref):
        return (i, colmap_ref[i, k])

    def hw_map(i, k, colmap_ref, mask_ref):
        return (colmap_ref[i, k], 0)

    def vec_map(i, k, colmap_ref, mask_ref):
        return (0, 0)

    def out_map(i, k, colmap_ref, mask_ref):
        return (i, 0)

    # Deepen the dominant (adj) DMA stream only when the reduction axis is
    # long enough for the extra buffer to matter.
    if n_tiles >= 3:
        adj_spec = pl.BlockSpec((tile, tile), adj_map,
                                pipeline_mode=pl.Buffered(3))
        n_adj_buf = 3
    else:
        adj_spec = pl.BlockSpec((tile, tile), adj_map)
        n_adj_buf = 2

    out_isz = jnp.dtype(out_dtype).itemsize
    vmem_bytes = (n_adj_buf * tile * tile * 2        # adj bf16
                  + 2 * tile * Fout * 2              # HW bf16
                  + 2 * tile * Fout * out_isz        # out
                  + tile * Fout * 4                  # f32 accumulator
                  + 6 * Fout * 4)                    # bias / BN vectors

    kernel = functools.partial(_agg_kernel, mode=mode, nclass=nclass)

    return pl.pallas_call(
        kernel,
        out_shape=jax.ShapeDtypeStruct((Np, Fout), out_dtype),
        grid_spec=pltpu.PrefetchScalarGridSpec(
            num_scalar_prefetch=2,
            grid=(n_tiles, n_tiles),
            in_specs=[
                adj_spec,                                   # adj tile (i, col)
                pl.BlockSpec((tile, Fout), hw_map),         # HW column tile
                pl.BlockSpec((1, Fout), vec_map),           # bias
                pl.BlockSpec((1, Fout), vec_map),           # BN scale
                pl.BlockSpec((1, Fout), vec_map),           # BN shift
            ],
            out_specs=pl.BlockSpec((tile, Fout), out_map),
            scratch_shapes=[pltpu.VMEM((tile, Fout), jnp.float32)],
        ),
        compiler_params=pltpu.CompilerParams(
            dimension_semantics=("parallel", "arbitrary"),
            vmem_limit_bytes=int(2 * vmem_bytes + (4 << 20)),
        ),
        cost_estimate=pl.CostEstimate(
            flops=int(2 * Np * Np * Fout),
            transcendentals=int(Np * Fout + Np) if mode == "logits" else 0,
            bytes_accessed=int(Np * Np * 2 + n_tiles * Np * Fout * 2
                               + Np * Fout * out_isz),
        ),
    )(colmap, mask, adj_p, hw_p, b_p, s_p, t_p)


# ---------------------------------------------------------------------------
# Adjacency preprocessing: pad/cast ONCE, reused across layers and calls.
# ---------------------------------------------------------------------------
def prepare_adjacency(adj, *, tile=None):
    N = adj.shape[0]
    if tile is None:
        tile = _choose_tile(N)
    Np = _round_up(N, tile)
    adj_p = jnp.zeros((Np, Np), jnp.bfloat16).at[:N, :N].set(
        adj.astype(jnp.bfloat16))

    nb = Np // tile
    tile_absmax = jnp.max(jnp.abs(adj_p).reshape(nb, tile, nb, tile),
                          axis=(1, 3))
    nonempty = tile_absmax > 0
    kidx = jnp.broadcast_to(jnp.arange(nb, dtype=jnp.int32)[None, :], (nb, nb))
    marked = jnp.where(nonempty, kidx, -1)
    prev = lax.cummax(marked, axis=1)
    # Empty tiles point at the last previously-fetched column block (or block
    # 0) so the pipeline elides their DMA; pl.when(mask) elides the matmul.
    colmap = jnp.where(prev >= 0, prev, 0).astype(jnp.int32)
    mask = nonempty.astype(jnp.int32)
    return dict(adj=adj_p, colmap=colmap, mask=mask, tile=tile, num_nodes=N)


# ---------------------------------------------------------------------------
# Wrapper: padding + the three layer calls.
# ---------------------------------------------------------------------------
def gcn_forward(x, adj, params, nclass, *, tile=None, adj_prepared=None):
    """x: [N, nfeat] f32, adj: [N, N] dense.  Returns [N, nclass] f32 log-probs."""
    N, nfeat = x.shape
    nhid = params["w1"].shape[1]

    if adj_prepared is None:
        adj_prepared = prepare_adjacency(adj, tile=tile)
    tile = adj_prepared["tile"]
    adj_p = adj_prepared["adj"]
    colmap = adj_prepared["colmap"]
    mask = adj_prepared["mask"]
    Np = adj_p.shape[0]
    assert adj_prepared["num_nodes"] == N

    Fp = _round_up(nfeat, 128)
    Hp = _round_up(nhid, 128)
    Cp = _round_up(nclass, 128)

    def pad2(a, rows, cols, dtype):
        out = jnp.zeros((rows, cols), dtype)
        return out.at[:a.shape[0], :a.shape[1]].set(a.astype(dtype))

    x_p = pad2(x, Np, Fp, jnp.bfloat16)

    w1_p = pad2(params["w1"], Fp, Hp, jnp.bfloat16)
    b1_p = pad2(params["b1"], 1, Hp, jnp.float32)
    s2_p = pad2(params["bn2_scale"], 1, Hp, jnp.float32)
    t2_p = pad2(params["bn2_shift"], 1, Hp, jnp.float32)

    w3_p = pad2(params["w3"], Hp, Hp, jnp.bfloat16)
    b3_p = pad2(params["b3"], 1, Hp, jnp.float32)
    s3_p = pad2(params["bn3_scale"], 1, Hp, jnp.float32)
    t3_p = pad2(params["bn3_shift"], 1, Hp, jnp.float32)

    w2_p = pad2(params["w2"], Hp, Cp, jnp.bfloat16)
    b2_p = pad2(params["b2"], 1, Cp, jnp.float32)
    ones_c = jnp.ones((1, Cp), jnp.float32)
    zeros_c = jnp.zeros((1, Cp), jnp.float32)

    # layer 1: gc1 -> relu -> dropout(eval) -> BN(eval)
    hw1 = _feature_transform(x_p, w1_p, tile=tile)
    h1 = _aggregate(adj_p, colmap, mask, hw1, b1_p, s2_p, t2_p,
                    mode="hidden", nclass=nhid, tile=tile,
                    out_dtype=jnp.bfloat16)
    # layer 2: gc3 -> relu -> BN(eval)
    hw2 = _feature_transform(h1, w3_p, tile=tile)
    h2 = _aggregate(adj_p, colmap, mask, hw2, b3_p, s3_p, t3_p,
                    mode="hidden", nclass=nhid, tile=tile,
                    out_dtype=jnp.bfloat16)
    # layer 3: gc2 -> log_softmax(dim=1)
    hw3 = _feature_transform(h2, w2_p, tile=tile)
    z = _aggregate(adj_p, colmap, mask, hw3, b2_p, ones_c, zeros_c,
                   mode="logits", nclass=nclass, tile=tile,
                   out_dtype=jnp.float32)
    # Mandatory: padded rows/class lanes contain -inf / garbage by design.
    return z[:N, :nclass]


# ---------------------------------------------------------------------------
# Parameter init mirroring the PyTorch module's reset_parameters (eval mode).
# ---------------------------------------------------------------------------
def init_params(key, nfeat, nhid, nclass, eps=1e-5):
    ks = jax.random.split(key, 6)

    def gc_init(kw, kb, fin, fout):
        stdv = 1.0 / math.sqrt(fout)
        w = jax.random.uniform(kw, (fin, fout), jnp.float32, -stdv, stdv)
        b = jax.random.uniform(kb, (1, fout), jnp.float32, -stdv, stdv)
        return w, b

    w1, b1 = gc_init(ks[0], ks[1], nfeat, nhid)
    w3, b3 = gc_init(ks[2], ks[3], nhid, nhid)
    w2, b2 = gc_init(ks[4], ks[5], nhid, nclass)

    def bn_affine(n):
        gamma = jnp.ones((1, n), jnp.float32)
        beta = jnp.zeros((1, n), jnp.float32)
        rmean = jnp.zeros((1, n), jnp.float32)
        rvar = jnp.ones((1, n), jnp.float32)
        scale = gamma / jnp.sqrt(rvar + eps)
        shift = beta - rmean * scale
        return scale, shift

    bn2_scale, bn2_shift = bn_affine(nhid)
    bn3_scale, bn3_shift = bn_affine(nhid)

    return dict(w1=w1, b1=b1, w3=w3, b3=b3, w2=w2, b2=b2,
                bn2_scale=bn2_scale, bn2_shift=bn2_shift,
                bn3_scale=bn3_scale, bn3_shift=bn3_shift)


if __name__ == "__main__":
    # Small but tiling-exercising shapes: tile=512 -> aggregation grid (2, 2),
    # two row tiles on the "parallel" axis (feeds both v7x TensorCores).
    N, nfeat, nhid, nclass = 1024, 64, 64, 10

    key = jax.random.PRNGKey(0)
    kx, kadj, kp = jax.random.split(key, 3)

    x = jax.random.normal(kx, (N, nfeat), jnp.float32)

    # Symmetric row-normalized dense adjacency with self-loops.
    a = (jax.random.uniform(kadj, (N, N)) > 0.9).astype(jnp.float32)
    a = jnp.maximum(a, a.T) + jnp.eye(N, dtype=jnp.float32)
    deg = jnp.sum(a, axis=1, keepdims=True)
    adj = a / deg

    params = init_params(kp, nfeat, nhid, nclass)

    # Adjacency padded/cast + tile-sparsity metadata built once, reused.
    adj_prep = prepare_adjacency(adj)
    out = gcn_forward(x, adj, params, nclass, adj_prepared=adj_prep)
    jax.block_until_ready(out)

    assert out.shape == (N, nclass)
    assert bool(jnp.all(jnp.isfinite(out)))
    # log_softmax sanity: each row must logsumexp to ~0 (computed in f32).
    row_lse = jax.scipy.special.logsumexp(out, axis=1)
    assert bool(jnp.allclose(row_lse, 0.0, atol=1e-3)), row_lse
    print("KERNEL_OK")
</pallas_src>

<mosaic_0001>
module attributes {stable_mosaic.version = 11 : i64} {
  func.func @_transform_kernel(%arg0: i32, %arg1: memref<512x128xbf16, #tpu.memory_space<vmem>>, %arg2: memref<128x128xbf16, #tpu.memory_space<vmem>>, %arg3: memref<512x128xbf16, #tpu.memory_space<vmem>>) attributes {dimension_semantics = [#tpu.dimension_semantics<parallel>], iteration_bounds = array<i64: 2>, scalar_prefetch = 0 : i64, scratch_operands = 0 : i64, tpu.core_type = #tpu.core_type<tc>, window_params = [{transform_indices = @transform_0, window_bounds = array<i64: 512, 128>}, {pipeline_mode = #tpu.pipeline_mode<synchronous>, transform_indices = @transform_1, window_bounds = array<i64: 128, 128>}, {transform_indices = @transform_2, window_bounds = array<i64: 512, 128>}]} {
    %c0 = arith.constant 0 : index
    %c0_0 = arith.constant 0 : index
    %0 = vector.load %arg1[%c0, %c0_0] : memref<512x128xbf16, #tpu.memory_space<vmem>>, vector<512x128xbf16>
    %c0_1 = arith.constant 0 : index
    %c0_2 = arith.constant 0 : index
    %1 = vector.load %arg2[%c0_1, %c0_2] : memref<128x128xbf16, #tpu.memory_space<vmem>>, vector<128x128xbf16>
    %cst = arith.constant dense<0.000000e+00> : vector<512x128xf32>
    %2 = tpu.matmul %0, %1, %cst {dimension_numbers = #tpu.dot_dimension_numbers<[1], [0], [0], [1], [0, 0, 1, 1], [], []>} : vector<512x128xbf16>, vector<128x128xbf16>, vector<512x128xf32> -> vector<512x128xf32>
    %3 = arith.truncf %2 : vector<512x128xf32> to vector<512x128xbf16>
    %c0_3 = arith.constant 0 : index
    %c0_4 = arith.constant 0 : index
    %4 = vector.load %arg3[%c0_3, %c0_4] : memref<512x128xbf16, #tpu.memory_space<vmem>>, vector<512x128xbf16>
    tpu.vector_store %arg3[%c0_3, %c0_4], %3 {strides = array<i32>} : memref<512x128xbf16, #tpu.memory_space<vmem>>, vector<512x128xbf16>,
    return
  }
  func.func @transform_0(%arg0: i32) -> (i32, i32) {
    %c0_i32 = arith.constant 0 : i32
    %c0_i32_0 = arith.constant 0 : i32
    return %arg0, %c0_i32 : i32, i32
  }
  func.func @transform_1(%arg0: i32) -> (i32, i32) {
    %c0_i32 = arith.constant 0 : i32
    %c0_i32_0 = arith.constant 0 : i32
    %c0_i32_1 = arith.constant 0 : i32
    return %c0_i32, %c0_i32_0 : i32, i32
  }
  func.func @transform_2(%arg0: i32) -> (i32, i32) {
    %c0_i32 = arith.constant 0 : i32
    %c0_i32_0 = arith.constant 0 : i32
    return %arg0, %c0_i32 : i32, i32
  }
}

</mosaic_0001>

<bundles_post_ra>
// kernel: tpu_custom_call.1
= control target key start
LH: loop header
LB: loop body
LE: loop exit
PB: predicated region body
PF: predicated region fallthrough
CT: control target
= control target key end

     0   :  { %7 = vsyncpa [#allocation3], 0  ;;  %s1762_s0 = inlined_call_operand.hbm [shape: bf16[1024,128], index: 0, kind: input, shape index: {}]   ;;  %s1763_s1 = inlined_call_operand.hbm [shape: bf16[128,128], index: 1, kind: input, shape index: {}]   ;;  %s1764_s2 = inlined_call_operand.hbm [shape: bf16[1024,128], index: 2, kind: output, shape index: {}]  }
   0x1   :  { %9 = vsyncpa [#allocation3 + $0x1], 0 }
   0x2   :  { %10 = vsyncpa [#allocation6], 0 }
   0x3   :  { %11 = vsyncpa [#allocation4], 0 }
   0x4   :  { %13 = vsyncpa [#allocation4 + $0x1], 0  ;;  %s1545_s9 = smov 0   ;;  %s1547_s10 = smov 0  }
   0x5   :  { %s1549_s11 = smov 0   ;;  %s1551_s12 = smov 0  }
   0x6 LB: > { %s1566_s13 = sadd.s32 4294967295, %s1523_s12   ;;  %s899_s14 = sadd.s32 4294967294, %s1523_s12   ;;  %s1523_s12 = sphi %s1551_s12, %s1774_s12   ;;  %s1519_s11 = sphi %s1549_s11, %s1773_s11   ;;  %s1515_s10 = sphi %s1547_s10, %s1772_s10   ;;  %s1511_s9 = sphi %s1545_s9, %s1771_s9  }
   0x7   : > { %p39_p0 = scmp.ne.s32.totalorder %s1515_s10, %s1511_s9  ;;  %p40_p1 = scmp.eq.s32.totalorder %s1566_s13, 0 }
   0x8   : > { %p84_p2 = scmp.eq.s32.totalorder %s1566_s13, 1  ;;  %p90_p3 = scmp.eq.s32.totalorder %s899_s14, 1 }
   0x9   : > { %p1575_p4 = por %p40_p1, %p39_p0  ;;  %p900_p5 = scmp.ge.s32.totalorder %s1523_s12, 1 }
   0xa   : > { %p1580_p6 = por %p90_p3, %p39_p0  ;;  %p97_p7 = scmp.lt.s32.totalorder %s1523_s12, 3 }
   0xb   : > { %s108_s19 = sshll.u32 %s1763_s1, 4  ;;  %s1525_s21 = smov [#allocation5]   ;;  %s109_s19 = int_to_ptr.hbm [resolvable:$true] %s108_s19 }
   0xc   : > { %p1588_p8 = pnand %p900_p5, %p97_p7  ;;  %s110_s22 = sshll.u32 %s1525_s21, 4  ;;  %s111_s22 = int_to_ptr.vmem [resolvable:$true] %s110_s22 }
   0xd   : > { %s1598_s23 = sadd.s32 1, %s1523_s12   ;;  %s1526_s24 = smov 64  }
   0xe   : > { %p1340_p9 = pneg %p1588_p8  ;;  %s1527_s25 = smov 4  }
   0xf   : > { %s23_s26 = ssub.s32 %s1523_s12, %s1598_s23  ;;  %s26_s27 = sadd.s32 1, %s1519_s11 }
  0x10   : > { %p1341_p10 = pnand %p1340_p9, %p40_p1  ;;  %p24_p12 = scmp.eq.s32.totalorder %s23_s26, 0 }
  0x11   : > { %p33_p13 = scmp.ne.s32.totalorder %s1519_s11, %s1515_s10  ;;  %p34_p0 = scmp.eq.s32.totalorder %s1523_s12, 0 }
  0x12   : > { %1343 = dma.hbm_to_vmem [thread:$0]  (!%p1341_p10), %s109_s19, 1024, %s111_s22, [#allocation6], %s1526_s24, %s1526_s24, %s1527_s25  }
  0x13   : > { %s1610_s28 = scalar_select %p24_p12, %s1519_s11, %s26_s27  }
  0x14   : > { %p1614_p3 = por %p84_p2, %p33_p13  ;;  %p1353_p5 = scmp.lt.s32.totalorder %s1523_s12, 2 }
  0x15   : > { %s124_s30 = sand.u32 1, %s1519_s11   ;;  %s1075_s3 = sshll.u32 %s1523_s12, 8 }
  0x16   : > { %p35_p7 = por %p34_p0, %p33_p13  ;;  %s903_s4 = sshll.u32 %s124_s30, 8 }
  0x17   : > { %s133_s7 = scalar_lea.hbm %s1762_s0, %s1075_s3  ;;  %s128_s14 = scalar_lea.vmem [#allocation2], %s903_s4 }
  0x18   : > { %s134_s8 = sshll.u32 %s133_s7, 4  ;;  %s136_s17 = sshll.u32 %s128_s14, 4  ;;  %s135_s8 = int_to_ptr.hbm [resolvable:$true] %s134_s8  ;;  %s137_s17 = int_to_ptr.vmem [resolvable:$true] %s136_s17 }
  0x19   : > { %p1624_p9 = pnand %p1353_p5, %p35_p7  ;;  %s125_s19 = scalar_lea.sflag [#allocation3], %s124_s30 }
  0x1a   : > { %s1423_s21 = sshra.s32 %s135_s8, 4  ;;  %s1430_s3 = scalar_lea.hbm %s1762_s0, 512  ;;  %s1424_s21 = int_to_ptr.hbm [resolvable:$true] %s1423_s21 }
  0x1b   : > { %s1425_s22 = scalar_lea.hbm %s1424_s21, 256  ;;  %p1427_p10 = pneg %p1624_p9 }
  0x1c   : > { %p1426_p2 = scmp.ne.s32.totalorder %s1424_s21, %s1425_s22  ;;  %p1431_p0 = scmp.lt.s32.totalorder %s1424_s21, %s1762_s0 }
  0x1d   : > { %p1432_p5 = scmp.lt.s32.totalorder %s1430_s3, %s1425_s22 }
  0x1e   : > { %p1428_p12 = pnand %p1427_p10, %p1426_p2 }
  0x1f   : > { %p1433_p7 = por %p1432_p5, %p1431_p0 }
  0x20   : > { %p1429_p13 = pneg %p1428_p12 }
  0x22   : > { %p1434_p11 = pnand %p1433_p7, %p1429_p13 }
  0x24   : > { %1437 = shalt.err (!%p1434_p11)
}
  0x25   : > { %1347 = dma.hbm_to_vmem [thread:$0]  (!%p1624_p9), %s135_s8, 4096, %s137_s17, %s125_s19, %s1526_s24, %s1526_s24, %s1527_s25  }
  0x26   : > { %148 = sbr.rel (%p1588_p8) target bundleno = 338 (0x152), region = 28  ;;  %s1644_s30 = sand.u32 (!%p1588_p8), 1, %s1515_s10  }
  0x27   : > { %s907_s6 = sshll.u32 (!%p1588_p8), %s1644_s30, 8  ;;  %s151_s7 = scalar_lea.sflag (!%p1588_p8), [#allocation3], %s1644_s30 }
  0x28   : > { %s1650_s14 = scalar_lea.vmem (!%p1588_p8), [#allocation2], %s907_s6 }
  0x2b   : > { %1498 = dma.done.wait (%p1575_p4), %s151_s7, 4096  }
  0x2c   : > { %1500 = vsyncadd (%p1575_p4), %s151_s7, 4294963200 }
  0x2d   : > { %1502 = dma.done.wait (%p40_p1), [#allocation6], 1024  }
  0x2e   : > { %1504 = vsyncadd (%p40_p1), [#allocation6], 4294966272  ;;  %v1115_v0 = vld [vmem:[#allocation5 + $0x38] sm:$0xff]  ;;  %v1114_v1 = vld [vmem:[#allocation5 + $0x30] sm:$0xff]  ;;  %s1694_s15 = scalar_lea.vmem [#allocation7], %s907_s6  ;;  %s1116_s20 = sshll.u32 %s1566_s13, 8 }
  0x2f   : > { %503 = vmatpush.bf16.msra.mxu0 %v1115_v0  ;;  %1308 = vmatpush.bf16.msra.mxu1 %v1115_v0  ;;  %v1113_v2 = vld [vmem:[#allocation5 + $0x28] sm:$0xff]  ;;  %v1112_v3 = vld [vmem:[#allocation5 + $0x20] sm:$0xff]  ;;  %v1111_v4 = vld [vmem:[#allocation5 + $0x18] sm:$0xff]  ;;  %s812_s8 = scalar_lea.hbm %s1764_s2, %s1116_s20  ;;  %s813_s17 = sshll.u32 %s1694_s15, 4  ;;  %s814_s17 = int_to_ptr.vmem [resolvable:$true] %s813_s17 }
  0x30   : > { %1309 = vmatpush.bf16.msra.mxu2 %v1115_v0  ;;  %1310 = vmatpush.bf16.msra.mxu3 %v1115_v0  ;;  %v1110_v5 = vld [vmem:[#allocation5 + $0x10] sm:$0xff]  ;;  %v1109_v6 = vld [vmem:[#allocation5 + $0x8] sm:$0xff]  ;;  %v1108_v7 = vld [vmem:[#allocation5] sm:$0xff]  ;;  %s815_s18 = sshll.u32 %s812_s8, 4  ;;  %s801_s13 = scalar_lea.sflag [#allocation4], %s1644_s30  ;;  %s816_s18 = int_to_ptr.hbm [resolvable:$true] %s815_s18 }
  0x31   : > { %v1076_v8 = vld [vmem:[%s1650_s14] sm:$0xff]  ;;  %v1077_v12 = vld [vmem:[%s1650_s14 + $0x8] sm:$0xff]  ;;  %v1078_v16 = vld [vmem:[%s1650_s14 + $0x10] sm:$0xff]  ;;  %s1467_s19 = sshra.s32 %s816_s18, 4  ;;  %s1473_s27 = scalar_lea.hbm %s1764_s2, 512  ;;  %s1468_s19 = int_to_ptr.hbm [resolvable:$true] %s1467_s19 }
  0x32   : > { %v1084_v9 = vld [vmem:[%s1650_s14 + $0x40] sm:$0xff]  ;;  %v1085_v13 = vld [vmem:[%s1650_s14 + $0x48] sm:$0xff]  ;;  %v1086_v17 = vld [vmem:[%s1650_s14 + $0x50] sm:$0xff]  ;;  %s1469_s21 = scalar_lea.hbm %s1468_s19, 256  ;;  %p1474_p11 = scmp.lt.s32.totalorder %s1468_s19, %s1764_s2 }
  0x33   : > { %504 = vmatpush.bf16.msra.mxu0 %v1114_v1  ;;  %1311 = vmatpush.bf16.msra.mxu1 %v1114_v1  ;;  %v1092_v10 = vld [vmem:[%s1650_s14 + $0x80] sm:$0xff]  ;;  %v1093_v14 = vld [vmem:[%s1650_s14 + $0x88] sm:$0xff]  ;;  %v1094_v18 = vld [vmem:[%s1650_s14 + $0x90] sm:$0xff]  ;;  %p1470_p1 = scmp.ne.s32.totalorder %s1468_s19, %s1469_s21  ;;  %p1475_p9 = scmp.lt.s32.totalorder %s1473_s27, %s1469_s21 }
  0x34   : > { %1312 = vmatpush.bf16.msra.mxu2 %v1114_v1  ;;  %1313 = vmatpush.bf16.msra.mxu3 %v1114_v1  ;;  %v1100_v11 = vld [vmem:[%s1650_s14 + $0xc0] sm:$0xff]  ;;  %v1101_v15 = vld [vmem:[%s1650_s14 + $0xc8] sm:$0xff]  ;;  %v1102_v19 = vld [vmem:[%s1650_s14 + $0xd0] sm:$0xff] }
  0x35   : > { %v1079_v20 = vld [vmem:[%s1650_s14 + $0x18] sm:$0xff]  ;;  %v1080_v24 = vld [vmem:[%s1650_s14 + $0x20] sm:$0xff]  ;;  %v1081_v28 = vld [vmem:[%s1650_s14 + $0x28] sm:$0xff]  ;;  %p1471_p4 = pnand %p1470_p1, %p1614_p3  ;;  %p1476_p2 = por %p1475_p9, %p1474_p11 }
  0x36   : > { %v1087_v21 = vld [vmem:[%s1650_s14 + $0x58] sm:$0xff]  ;;  %v1088_v25 = vld [vmem:[%s1650_s14 + $0x60] sm:$0xff]  ;;  %v1089_v29 = vld [vmem:[%s1650_s14 + $0x68] sm:$0xff] }
  0x37   : > { %505 = vmatpush.bf16.msra.mxu0 %v1113_v2  ;;  %1314 = vmatpush.bf16.msra.mxu1 %v1113_v2  ;;  %v1095_v22 = vld [vmem:[%s1650_s14 + $0x98] sm:$0xff]  ;;  %v1096_v26 = vld [vmem:[%s1650_s14 + $0xa0] sm:$0xff]  ;;  %v1097_v30 = vld [vmem:[%s1650_s14 + $0xa8] sm:$0xff]  ;;  %p1472_p8 = pneg %p1471_p4 }
  0x38   : > { %1315 = vmatpush.bf16.msra.mxu2 %v1113_v2  ;;  %1316 = vmatpush.bf16.msra.mxu3 %v1113_v2  ;;  %v1103_v23 = vld [vmem:[%s1650_s14 + $0xd8] sm:$0xff]  ;;  %v1104_v27 = vld [vmem:[%s1650_s14 + $0xe0] sm:$0xff]  ;;  %v1105_v31 = vld [vmem:[%s1650_s14 + $0xe8] sm:$0xff] }
  0x39   : > { %v1082_v32 = vld [vmem:[%s1650_s14 + $0x30] sm:$0xff]  ;;  %v1083_v36 = vld [vmem:[%s1650_s14 + $0x38] sm:$0xff]  ;;  %p1477_p10 = pnand %p1476_p2, %p1472_p8 }
  0x3a   : > { %v1090_v33 = vld [vmem:[%s1650_s14 + $0x70] sm:$0xff]  ;;  %v1091_v37 = vld [vmem:[%s1650_s14 + $0x78] sm:$0xff] }
  0x3b   : > { %506 = vmatpush.bf16.msra.mxu0 %v1112_v3  ;;  %1317 = vmatpush.bf16.msra.mxu1 %v1112_v3  ;;  %v1098_v34 = vld [vmem:[%s1650_s14 + $0xb0] sm:$0xff]  ;;  %v1099_v38 = vld [vmem:[%s1650_s14 + $0xb8] sm:$0xff] }
  0x3c   : > { %1318 = vmatpush.bf16.msra.mxu2 %v1112_v3  ;;  %1319 = vmatpush.bf16.msra.mxu3 %v1112_v3  ;;  %v1106_v35 = vld [vmem:[%s1650_s14 + $0xf0] sm:$0xff]  ;;  %v1107_v39 = vld [vmem:[%s1650_s14 + $0xf8] sm:$0xff] }
  0x3f   : > { %507 = vmatpush.bf16.msra.mxu0 %v1111_v4  ;;  %1320 = vmatpush.bf16.msra.mxu1 %v1111_v4 }
  0x40   : > { %1321 = vmatpush.bf16.msra.mxu2 %v1111_v4  ;;  %1322 = vmatpush.bf16.msra.mxu3 %v1111_v4 }
  0x43   : > { %508 = vmatpush.bf16.msra.mxu0 %v1110_v5  ;;  %1323 = vmatpush.bf16.msra.mxu1 %v1110_v5 }
  0x44   : > { %1324 = vmatpush.bf16.msra.mxu2 %v1110_v5  ;;  %1325 = vmatpush.bf16.msra.mxu3 %v1110_v5 }
  0x47   : > { %509 = vmatpush.bf16.msra.mxu0 %v1109_v6  ;;  %1326 = vmatpush.bf16.msra.mxu1 %v1109_v6 }
  0x48   : > { %1327 = vmatpush.bf16.msra.mxu2 %v1109_v6  ;;  %1328 = vmatpush.bf16.msra.mxu3 %v1109_v6 }
  0x4b   : > { %510 = vmatpush.bf16.msra.mxu0 %v1108_v7  ;;  %1329 = vmatpush.bf16.msra.mxu1 %v1108_v7 }
  0x4c   : > { %1330 = vmatpush.bf16.msra.mxu2 %v1108_v7  ;;  %1331 = vmatpush.bf16.msra.mxu3 %v1108_v7 }
  0x4e   : > { %511 = vmatmul.bf16.vlgmr.msra.gmra.mxu0 %v1076_v8  ;;  %551 = vmatmul.bf16.vlgmr.msra.gmra.mxu1 %v1084_v9 }
  0x4f   : > { %591 = vmatmul.bf16.vlgmr.msra.gmra.mxu2 %v1092_v10  ;;  %631 = vmatmul.bf16.vlgmr.msra.gmra.mxu3 %v1100_v11 }
  0x5e   : > { %516 = vmatmul.bf16.gmra.mxu0 %v1077_v12  ;;  %556 = vmatmul.bf16.gmra.mxu1 %v1085_v13 }
  0x5f   : > { %596 = vmatmul.bf16.gmra.mxu2 %v1093_v14  ;;  %636 = vmatmul.bf16.gmra.mxu3 %v1101_v15 }
  0x6e   : > { %521 = vmatmul.bf16.gmra.mxu0 %v1078_v16  ;;  %561 = vmatmul.bf16.gmra.mxu1 %v1086_v17 }
  0x6f   : > { %601 = vmatmul.bf16.gmra.mxu2 %v1094_v18  ;;  %641 = vmatmul.bf16.gmra.mxu3 %v1102_v19 }
  0x7e   : > { %526 = vmatmul.bf16.gmra.mxu0 %v1079_v20  ;;  %566 = vmatmul.bf16.gmra.mxu1 %v1087_v21 }
  0x7f   : > { %606 = vmatmul.bf16.gmra.mxu2 %v1095_v22  ;;  %646 = vmatmul.bf16.gmra.mxu3 %v1103_v23 }
  0x8e   : > { %531 = vmatmul.bf16.gmra.mxu0 %v1080_v24  ;;  %571 = vmatmul.bf16.gmra.mxu1 %v1088_v25 }
  0x8f   : > { %611 = vmatmul.bf16.gmra.mxu2 %v1096_v26  ;;  %651 = vmatmul.bf16.gmra.mxu3 %v1104_v27 }
  0x9e   : > { %536 = vmatmul.bf16.gmra.mxu0 %v1081_v28  ;;  %576 = vmatmul.bf16.gmra.mxu1 %v1089_v29 }
  0x9f   : > { %616 = vmatmul.bf16.gmra.mxu2 %v1097_v30  ;;  %656 = vmatmul.bf16.gmra.mxu3 %v1105_v31 }
  0xae   : > { %541 = vmatmul.bf16.gmra.mxu0 %v1082_v32  ;;  %581 = vmatmul.bf16.gmra.mxu1 %v1090_v33 }
  0xaf   : > { %621 = vmatmul.bf16.gmra.mxu2 %v1098_v34  ;;  %661 = vmatmul.bf16.gmra.mxu3 %v1106_v35 }
  0xbe   : > { %546 = vmatmul.bf16.gmra.mxu0 %v1083_v36  ;;  %586 = vmatmul.bf16.gmra.mxu1 %v1091_v37 }
  0xbf   : > { %626 = vmatmul.bf16.gmra.mxu2 %v1099_v38  ;;  %666 = vmatmul.bf16.gmra.mxu3 %v1107_v39 }
  0xcb   : > { %v512_v40 = vpop.f32.mrf.mxu0  ;;  %v552_v41 = vpop.f32.mrf.mxu1 }
  0xd2   : > { %v592_v42 = vpop.f32.mrf.mxu2  ;;  %v632_v43 = vpop.f32.mrf.mxu3 }
  0xd3   : > { %v514_v44 = vpop.f32.mrf.mxu0  ;;  %v554_v45 = vpop.f32.mrf.mxu1 }
  0xd4   : > { %v1120_v46 = vpack.c.bf16 %v514_v44, %v512_v40  ;;  %v1160_v47 = vpack.c.bf16 %v554_v45, %v552_v41 }
  0xd6   : > { %1121 = vst [vmem:[%s1694_s15] sm:$0xff] %v1120_v46  }
  0xd7   : > { %1284 = vst [vmem:[%s1694_s15 + $0x40] sm:$0xff] %v1160_v47  }
  0xda   : > { %v594_v48 = vpop.f32.mrf.mxu2  ;;  %v634_v49 = vpop.f32.mrf.mxu3 }
  0xdb   : > { %v1200_v50 = vpack.c.bf16 %v594_v48, %v592_v42  ;;  %v1240_v51 = vpack.c.bf16 %v634_v49, %v632_v43  ;;  %v517_v52 = vpop.f32.mrf.mxu0  ;;  %v557_v53 = vpop.f32.mrf.mxu1 }
  0xdd   : > { %1292 = vst [vmem:[%s1694_s15 + $0x80] sm:$0xff] %v1200_v50  }
  0xde   : > { %1300 = vst [vmem:[%s1694_s15 + $0xc0] sm:$0xff] %v1240_v51  }
  0xe2   : > { %v597_v54 = vpop.f32.mrf.mxu2  ;;  %v637_v55 = vpop.f32.mrf.mxu3 }
  0xe3   : > { %v519_v56 = vpop.f32.mrf.mxu0  ;;  %v559_v57 = vpop.f32.mrf.mxu1 }
  0xe4   : > { %v1125_v58 = vpack.c.bf16 %v519_v56, %v517_v52  ;;  %v1165_v59 = vpack.c.bf16 %v559_v57, %v557_v53 }
  0xe6   : > { %1277 = vst [vmem:[%s1694_s15 + $0x8] sm:$0xff] %v1125_v58  }
  0xe7   : > { %1285 = vst [vmem:[%s1694_s15 + $0x48] sm:$0xff] %v1165_v59  }
  0xea   : > { %v599_v60 = vpop.f32.mrf.mxu2  ;;  %v639_v61 = vpop.f32.mrf.mxu3 }
  0xeb   : > { %v1205_v62 = vpack.c.bf16 %v599_v60, %v597_v54  ;;  %v1245_v63 = vpack.c.bf16 %v639_v61, %v637_v55  ;;  %v522_v0 = vpop.f32.mrf.mxu0  ;;  %v562_v1 = vpop.f32.mrf.mxu1 }
  0xed   : > { %1293 = vst [vmem:[%s1694_s15 + $0x88] sm:$0xff] %v1205_v62  }
  0xee   : > { %1301 = vst [vmem:[%s1694_s15 + $0xc8] sm:$0xff] %v1245_v63  }
  0xf2   : > { %v602_v2 = vpop.f32.mrf.mxu2  ;;  %v642_v3 = vpop.f32.mrf.mxu3 }
  0xf3   : > { %v524_v4 = vpop.f32.mrf.mxu0  ;;  %v564_v5 = vpop.f32.mrf.mxu1 }
  0xf4   : > { %v1130_v6 = vpack.c.bf16 %v524_v4, %v522_v0  ;;  %v1170_v7 = vpack.c.bf16 %v564_v5, %v562_v1 }
  0xf6   : > { %1278 = vst [vmem:[%s1694_s15 + $0x10] sm:$0xff] %v1130_v6  }
  0xf7   : > { %1286 = vst [vmem:[%s1694_s15 + $0x50] sm:$0xff] %v1170_v7  }
  0xfa   : > { %v604_v8 = vpop.f32.mrf.mxu2  ;;  %v644_v9 = vpop.f32.mrf.mxu3 }
  0xfb   : > { %v1210_v10 = vpack.c.bf16 %v604_v8, %v602_v2  ;;  %v1250_v11 = vpack.c.bf16 %v644_v9, %v642_v3  ;;  %v527_v12 = vpop.f32.mrf.mxu0  ;;  %v567_v13 = vpop.f32.mrf.mxu1 }
  0xfd   : > { %1294 = vst [vmem:[%s1694_s15 + $0x90] sm:$0xff] %v1210_v10  }
  0xfe   : > { %1302 = vst [vmem:[%s1694_s15 + $0xd0] sm:$0xff] %v1250_v11  }
 0x102   : > { %v607_v14 = vpop.f32.mrf.mxu2  ;;  %v647_v15 = vpop.f32.mrf.mxu3 }
 0x103   : > { %v529_v16 = vpop.f32.mrf.mxu0  ;;  %v569_v17 = vpop.f32.mrf.mxu1 }
 0x104   : > { %v1135_v18 = vpack.c.bf16 %v529_v16, %v527_v12  ;;  %v1175_v19 = vpack.c.bf16 %v569_v17, %v567_v13 }
 0x106   : > { %1279 = vst [vmem:[%s1694_s15 + $0x18] sm:$0xff] %v1135_v18  }
 0x107   : > { %1287 = vst [vmem:[%s1694_s15 + $0x58] sm:$0xff] %v1175_v19  }
 0x10a   : > { %v609_v20 = vpop.f32.mrf.mxu2  ;;  %v649_v21 = vpop.f32.mrf.mxu3 }
 0x10b   : > { %v1215_v22 = vpack.c.bf16 %v609_v20, %v607_v14  ;;  %v1255_v23 = vpack.c.bf16 %v649_v21, %v647_v15  ;;  %v532_v24 = vpop.f32.mrf.mxu0  ;;  %v572_v25 = vpop.f32.mrf.mxu1 }
 0x10d   : > { %1295 = vst [vmem:[%s1694_s15 + $0x98] sm:$0xff] %v1215_v22  }
 0x10e   : > { %1303 = vst [vmem:[%s1694_s15 + $0xd8] sm:$0xff] %v1255_v23  }
 0x112   : > { %v612_v26 = vpop.f32.mrf.mxu2  ;;  %v652_v27 = vpop.f32.mrf.mxu3 }
 0x113   : > { %v534_v28 = vpop.f32.mrf.mxu0  ;;  %v574_v29 = vpop.f32.mrf.mxu1 }
 0x114   : > { %v1140_v30 = vpack.c.bf16 %v534_v28, %v532_v24  ;;  %v1180_v31 = vpack.c.bf16 %v574_v29, %v572_v25 }
 0x116   : > { %1280 = vst [vmem:[%s1694_s15 + $0x20] sm:$0xff] %v1140_v30  }
 0x117   : > { %1288 = vst [vmem:[%s1694_s15 + $0x60] sm:$0xff] %v1180_v31  }
 0x11a   : > { %v614_v32 = vpop.f32.mrf.mxu2  ;;  %v654_v33 = vpop.f32.mrf.mxu3 }
 0x11b   : > { %v1220_v34 = vpack.c.bf16 %v614_v32, %v612_v26  ;;  %v1260_v35 = vpack.c.bf16 %v654_v33, %v652_v27  ;;  %v537_v36 = vpop.f32.mrf.mxu0  ;;  %v577_v37 = vpop.f32.mrf.mxu1 }
 0x11d   : > { %1296 = vst [vmem:[%s1694_s15 + $0xa0] sm:$0xff] %v1220_v34  }
 0x11e   : > { %1304 = vst [vmem:[%s1694_s15 + $0xe0] sm:$0xff] %v1260_v35  }
 0x122   : > { %v617_v38 = vpop.f32.mrf.mxu2  ;;  %v657_v39 = vpop.f32.mrf.mxu3 }
 0x123   : > { %v539_v40 = vpop.f32.mrf.mxu0  ;;  %v579_v41 = vpop.f32.mrf.mxu1 }
 0x124   : > { %v1145_v42 = vpack.c.bf16 %v539_v40, %v537_v36  ;;  %v1185_v43 = vpack.c.bf16 %v579_v41, %v577_v37 }
 0x126   : > { %1281 = vst [vmem:[%s1694_s15 + $0x28] sm:$0xff] %v1145_v42  }
 0x127   : > { %1289 = vst [vmem:[%s1694_s15 + $0x68] sm:$0xff] %v1185_v43  }
 0x12a   : > { %v619_v44 = vpop.f32.mrf.mxu2  ;;  %v659_v45 = vpop.f32.mrf.mxu3 }
 0x12b   : > { %v1225_v46 = vpack.c.bf16 %v619_v44, %v617_v38  ;;  %v1265_v47 = vpack.c.bf16 %v659_v45, %v657_v39  ;;  %v542_v48 = vpop.f32.mrf.mxu0  ;;  %v582_v49 = vpop.f32.mrf.mxu1 }
 0x12d   : > { %1297 = vst [vmem:[%s1694_s15 + $0xa8] sm:$0xff] %v1225_v46  }
 0x12e   : > { %1305 = vst [vmem:[%s1694_s15 + $0xe8] sm:$0xff] %v1265_v47  }
 0x132   : > { %v622_v50 = vpop.f32.mrf.mxu2  ;;  %v662_v51 = vpop.f32.mrf.mxu3 }
 0x133   : > { %v544_v52 = vpop.f32.mrf.mxu0  ;;  %v584_v53 = vpop.f32.mrf.mxu1 }
 0x134   : > { %v1150_v54 = vpack.c.bf16 %v544_v52, %v542_v48  ;;  %v1190_v55 = vpack.c.bf16 %v584_v53, %v582_v49 }
 0x136   : > { %1282 = vst [vmem:[%s1694_s15 + $0x30] sm:$0xff] %v1150_v54  }
 0x137   : > { %1290 = vst [vmem:[%s1694_s15 + $0x70] sm:$0xff] %v1190_v55  }
 0x13a   : > { %v624_v56 = vpop.f32.mrf.mxu2  ;;  %v664_v57 = vpop.f32.mrf.mxu3 }
 0x13b   : > { %v1230_v58 = vpack.c.bf16 %v624_v56, %v622_v50  ;;  %v1270_v59 = vpack.c.bf16 %v664_v57, %v662_v51  ;;  %v547_v60 = vpop.f32.mrf.mxu0  ;;  %v587_v61 = vpop.f32.mrf.mxu1 }
 0x13d   : > { %1298 = vst [vmem:[%s1694_s15 + $0xb0] sm:$0xff] %v1230_v58  }
 0x13e   : > { %1306 = vst [vmem:[%s1694_s15 + $0xf0] sm:$0xff] %v1270_v59  }
 0x142   : > { %v627_v62 = vpop.f32.mrf.mxu2  ;;  %v667_v63 = vpop.f32.mrf.mxu3 }
 0x143   : > { %v549_v0 = vpop.f32.mrf.mxu0  ;;  %v589_v1 = vpop.f32.mrf.mxu1 }
 0x144   : > { %v1155_v2 = vpack.c.bf16 %v549_v0, %v547_v60  ;;  %v1195_v3 = vpack.c.bf16 %v589_v1, %v587_v61 }
 0x146   : > { %1283 = vst [vmem:[%s1694_s15 + $0x38] sm:$0xff] %v1155_v2  }
 0x147   : > { %1291 = vst [vmem:[%s1694_s15 + $0x78] sm:$0xff] %v1195_v3  }
 0x14a   : > { %v629_v4 = vpop.f32.mrf.mxu2  ;;  %v669_v5 = vpop.f32.mrf.mxu3 }
 0x14b   : > { %v1235_v6 = vpack.c.bf16 %v629_v4, %v627_v62  ;;  %v1275_v7 = vpack.c.bf16 %v669_v5, %v667_v63 }
 0x14d   : > { %1299 = vst [vmem:[%s1694_s15 + $0xb8] sm:$0xff] %v1235_v6  }
 0x14e   : > { %1307 = vst [vmem:[%s1694_s15 + $0xf8] sm:$0xff] %v1275_v7  }
 0x14f   : > { %1480 = shalt.err (!%p1477_p10)
}
 0x150   : > { %s1528_s5 = smov 64   ;;  %s1529_s30 = smov 4  }
 0x151   : > { %1338 = dma.vmem_to_hbm [thread:$0]  (%p1614_p3), %s814_s17, 4096, %s816_s18, %s801_s13, %s1528_s5, %s1528_s5, %s1529_s30  }
 0x152 PF: > { %s830_s6 = sand.u32 1, %s1511_s9   ;;  %p1770_p12 = scmp.ge.s32.totalorder %s1523_s12, 2 }
 0x153   : > { %s831_s7 = scalar_lea.sflag [#allocation4], %s830_s6 }
 0x154   : > { %p1349_p13 = pnand %p1770_p12, %p1580_p6 }
 0x156   : > { %p1350_p0 = pneg %p1349_p13 }
 0x158   : > { %1506 = dma.done.wait (%p1350_p0), %s831_s7, 4096  }
 0x159   : > { %1508 = vsyncadd (%p1350_p0), %s831_s7, 4294963200  ;;  %p16_p5 = scmp.ge.s32.totalorder %s1598_s23, 4   ;;  %s1771_s9 = smov %s1515_s10 }
 0x15a   : > { %s1772_s10 = smov %s1519_s11  ;;  %s1773_s11 = smov %s1610_s28 }
 0x15b   : > { %s1774_s12 = smov %s1598_s23  ;;  %18 = sbr.rel (!%p16_p5) target bundleno = 6 (0x6), region = 77 }
 0x160   :  { %837 = vsyncpa [#allocation3], 1 }
 0x161   :  { %839 = vsyncpa [#allocation3 + $0x1], 1 }
 0x162   :  { %840 = vsyncpa [#allocation6], 1 }
 0x163   :  { %841 = vsyncpa [#allocation4], 1 }
 0x164   :  { %843 = vsyncpa [#allocation4 + $0x1], 1 }

</bundles_post_ra>
